<compile_context>
chip_gen: v6e
topology: v6e:2x2x1
jax: 0.10.0
libtpu: 0.0.40
codegen_flags: <defaults>
</compile_context>

<pallas_src>
import functools

import numpy as np
import jax
import jax.numpy as jnp
from jax import lax
from jax.experimental import pallas as pl
from jax.experimental.pallas import tpu as pltpu


def _round_up(x, m):
    return (x + m - 1) // m * m


# ---------------------------------------------------------------------------
# Pass A: conv1 as K per-tap accumulating MXU matmuls + BN1 partial statistics.
# Input x block is already zero-padded along L (halo) and C (lanes) on the host.
# ---------------------------------------------------------------------------
def _conv1_stats_kernel(x_ref, w1_ref, h1_ref, st_ref, *, length, ksize):
    c_out = w1_ref.shape[2]
    acc = jnp.zeros((length, c_out), jnp.float32)
    for t in range(ksize):                               # static unroll, K small
        acc += jnp.dot(x_ref[0, pl.ds(t, length), :], w1_ref[t],
                       preferred_element_type=jnp.float32)
    h1 = acc.astype(h1_ref.dtype)
    h1_ref[0] = h1

    # BN1 partial sums on the MXU (frees the binding VALU slot).  Stats are
    # taken on the value actually stored (consistent with what pass B reads).
    hs = h1.astype(jnp.float32)
    ones = jnp.ones((8, length), jnp.float32)
    s = jnp.dot(ones, hs, preferred_element_type=jnp.float32)
    ss = jnp.dot(ones, hs * hs, preferred_element_type=jnp.float32)
    st_ref[0] = jnp.concatenate([s[0:1], ss[0:1]], axis=0)      # (2, C): [sum, sumsq]


# ---------------------------------------------------------------------------
# Pass B: BN1 scale/shift + ReLU (f32), conv2 via a small padded VMEM scratch
# (halo rows = conv zero padding) + BN2 partial statistics.
# ---------------------------------------------------------------------------
def _bn1_conv2_stats_kernel(h1_ref, sc1_ref, sh1_ref, w2_ref, h2_ref, st_ref,
                            apad_s, *, length, pad, ksize):
    c_out = w2_ref.shape[2]
    a1 = jnp.maximum(h1_ref[0].astype(jnp.float32) * sc1_ref[...] + sh1_ref[...],
                     0.0).astype(apad_s.dtype)
    zrow = jnp.zeros((pad, c_out), apad_s.dtype)
    apad_s[...] = jnp.concatenate([zrow, a1, zrow], axis=0)     # aligned full store

    acc = jnp.zeros((length, c_out), jnp.float32)
    for t in range(ksize):
        acc += jnp.dot(apad_s[pl.ds(t, length), :], w2_ref[t],
                       preferred_element_type=jnp.float32)
    h2 = acc.astype(h2_ref.dtype)
    h2_ref[0] = h2

    hs = h2.astype(jnp.float32)
    ones = jnp.ones((8, length), jnp.float32)
    s = jnp.dot(ones, hs, preferred_element_type=jnp.float32)
    ss = jnp.dot(ones, hs * hs, preferred_element_type=jnp.float32)
    st_ref[0] = jnp.concatenate([s[0:1], ss[0:1]], axis=0)


# ---------------------------------------------------------------------------
# Pass C: BN2 scale/shift + 1x1 shortcut (res_weight pre-folded) + add + ReLU.
# ---------------------------------------------------------------------------
def _finalize_kernel(h2_ref, x_ref, wsc_ref, bsc_ref, sc2_ref, sh2_ref, o_ref,
                     *, length, pad):
    xm = x_ref[0, pl.ds(pad, length), :]                 # skip the L halo rows
    ident = jnp.dot(xm, wsc_ref[...],
                    preferred_element_type=jnp.float32) + bsc_ref[...]
    out = h2_ref[0].astype(jnp.float32) * sc2_ref[...] + sh2_ref[...] + ident
    o_ref[0] = jnp.maximum(out, 0.0)


# ---------------------------------------------------------------------------
# Host-side combination of per-tile BN partial stats -> per-channel scale/shift.
# ---------------------------------------------------------------------------
def _bn_scale_shift(stats, gamma, beta, count, eps):
    """stats: (num_tiles, 2, C) partial [sum, sumsq] -> (1,C) scale, (1,C) shift."""
    sums = jnp.sum(stats, axis=0)                        # (2, C)
    mean = sums[0] / count
    var = jnp.maximum(sums[1] / count - mean * mean, 0.0)   # clamp: cancellation guard
    scale = gamma * lax.rsqrt(var + eps)
    shift = beta - mean * scale
    return scale.reshape(1, -1), shift.reshape(1, -1)


def precision_block(x_ncl, params, *, eps=1e-5, mm_dtype=jnp.bfloat16,
                    lane_multiple=128):
    """x_ncl: (N, C_in, L) f32 (PyTorch Conv1d layout). Returns (N, C_out, L) f32.
    mm_dtype: matmul-operand / HBM-intermediate dtype (bf16 recommended on v6e/v7x)."""
    w1, b1, g1, be1, w2, b2, g2, be2, res_w, wsc, bsc = params
    n, c_in, length = x_ncl.shape
    c_out, _, ksize = w1.shape
    pad = ksize // 2
    f32 = jnp.float32
    nl = n * length

    ci = _round_up(c_in, lane_multiple)      # lane-dense conv1 / shortcut contraction
    co = _round_up(c_out, lane_multiple)     # lane-dense outputs (unmasked stores)
    lp = length + 2 * pad

    # NCL -> NLC, cast to mm_dtype, zero-pad L (conv halo) and C (lane density)
    # in one host-side fusion.  TODO(synk): downstream consumers accepting NLC
    # would remove this and the final output transpose (one HBM pass each).
    x_pad = jnp.pad(jnp.transpose(x_ncl, (0, 2, 1)).astype(mm_dtype),
                    ((0, 0), (pad, pad), (0, ci - c_in)))

    def taps(w, cin_p):
        # (Cout, Cin, K) -> (K, cin_p, co); tap t matrix [c, o] = w[o, c, t].
        wt = jnp.transpose(w, (2, 1, 0)).astype(mm_dtype)
        return jnp.pad(wt, ((0, 0), (0, cin_p - wt.shape[1]), (0, co - wt.shape[2])))

    w1_t = taps(w1, ci)
    w2_t = taps(w2, co)

    # conv biases never reach the device: training-mode BN mean subtraction
    # cancels them exactly.
    del b1, b2

    # Fold res_weight into the 1x1 shortcut weight/bias (tiny host op, not an
    # input pre-scale).
    rw = res_w.reshape(()).astype(f32)
    wsc_m = jnp.pad((jnp.transpose(wsc[:, :, 0], (1, 0)) * rw).astype(mm_dtype),
                    ((0, ci - c_in), (0, co - c_out)))
    bsc_v = jnp.pad(bsc.astype(f32) * rw, (0, co - c_out)).reshape(1, co)

    def padc(v):
        return jnp.pad(v.astype(f32), (0, co - c_out))

    g1p, be1p, g2p, be2p = padc(g1), padc(be1), padc(g2), padc(be2)

    cparams = pltpu.CompilerParams(
        dimension_semantics=("parallel",),   # pipelined batch tiles; v7x megacore
        # safe under v7x's 64 MiB physical VMEM; raise toward ~100 MiB on
        # v5e/v6e if larger (L-tiled) blocks are used.
        vmem_limit_bytes=48 * 1024 * 1024)

    # ---- pass A: conv1 + BN1 partial stats --------------------------------
    h1, st1 = pl.pallas_call(
        functools.partial(_conv1_stats_kernel, length=length, ksize=ksize),
        grid=(n,),
        in_specs=[
            pl.BlockSpec((1, lp, ci), lambda i: (i, 0, 0)),
            pl.BlockSpec((ksize, ci, co), lambda i: (0, 0, 0)),   # resident weights
        ],
        out_specs=[
            pl.BlockSpec((1, length, co), lambda i: (i, 0, 0)),
            pl.BlockSpec((1, 2, co), lambda i: (i, 0, 0)),
        ],
        out_shape=[
            jax.ShapeDtypeStruct((n, length, co), mm_dtype),
            jax.ShapeDtypeStruct((n, 2, co), f32),
        ],
        compiler_params=cparams,
    )(x_pad, w1_t)

    sc1, sh1 = _bn_scale_shift(st1, g1p, be1p, nl, eps)

    # ---- pass B: BN1 + ReLU -> conv2 + BN2 partial stats -------------------
    h2, st2 = pl.pallas_call(
        functools.partial(_bn1_conv2_stats_kernel,
                          length=length, pad=pad, ksize=ksize),
        grid=(n,),
        in_specs=[
            pl.BlockSpec((1, length, co), lambda i: (i, 0, 0)),
            pl.BlockSpec((1, co), lambda i: (0, 0)),
            pl.BlockSpec((1, co), lambda i: (0, 0)),
            pl.BlockSpec((ksize, co, co), lambda i: (0, 0, 0)),
        ],
        out_specs=[
            pl.BlockSpec((1, length, co), lambda i: (i, 0, 0)),
            pl.BlockSpec((1, 2, co), lambda i: (i, 0, 0)),
        ],
        out_shape=[
            jax.ShapeDtypeStruct((n, length, co), mm_dtype),
            jax.ShapeDtypeStruct((n, 2, co), f32),
        ],
        scratch_shapes=[pltpu.VMEM((lp, co), mm_dtype)],
        compiler_params=cparams,
    )(h1, sc1, sh1, w2_t)

    sc2, sh2 = _bn_scale_shift(st2, g2p, be2p, nl, eps)

    # ---- pass C: BN2 + shortcut + ReLU -------------------------------------
    out_nlc = pl.pallas_call(
        functools.partial(_finalize_kernel, length=length, pad=pad),
        grid=(n,),
        in_specs=[
            pl.BlockSpec((1, length, co), lambda i: (i, 0, 0)),
            pl.BlockSpec((1, lp, ci), lambda i: (i, 0, 0)),
            pl.BlockSpec((ci, co), lambda i: (0, 0)),
            pl.BlockSpec((1, co), lambda i: (0, 0)),
            pl.BlockSpec((1, co), lambda i: (0, 0)),
            pl.BlockSpec((1, co), lambda i: (0, 0)),
        ],
        out_specs=pl.BlockSpec((1, length, co), lambda i: (i, 0, 0)),
        out_shape=jax.ShapeDtypeStruct((n, length, co), f32),
        compiler_params=cparams,
    )(h2, x_pad, wsc_m, bsc_v, sc2, sh2)

    # drop the zero lane-padding channels, back to PyTorch (N, C_out, L).
    return jnp.transpose(out_nlc[:, :, :c_out], (0, 2, 1))


def init_params(key, c_in, c_out, ksize):
    """Deterministic init mirroring the PyTorch module's parameter shapes."""
    ks = jax.random.split(key, 6)
    s1 = 1.0 / np.sqrt(c_in * ksize)
    s2 = 1.0 / np.sqrt(c_out * ksize)
    ssc = 1.0 / np.sqrt(c_in)
    w1 = jax.random.uniform(ks[0], (c_out, c_in, ksize), jnp.float32, -s1, s1)
    b1 = jax.random.uniform(ks[1], (c_out,), jnp.float32, -s1, s1)
    w2 = jax.random.uniform(ks[2], (c_out, c_out, ksize), jnp.float32, -s2, s2)
    b2 = jax.random.uniform(ks[3], (c_out,), jnp.float32, -s2, s2)
    g1, be1 = jnp.ones((c_out,), jnp.float32), jnp.zeros((c_out,), jnp.float32)
    g2, be2 = jnp.ones((c_out,), jnp.float32), jnp.zeros((c_out,), jnp.float32)
    res_w = jnp.ones((1,), jnp.float32)                 # torch.ones(1)
    wsc = jax.random.uniform(ks[4], (c_out, c_in, 1), jnp.float32, -ssc, ssc)
    bsc = jax.random.uniform(ks[5], (c_out,), jnp.float32, -ssc, ssc)
    return (w1, b1, g1, be1, w2, b2, g2, be2, res_w, wsc, bsc)


def reference(x_ncl, params, eps=1e-5):
    """Pure-JAX reference of the PyTorch forward (training-mode BN, WITH biases,
    un-folded res_weight) — validates the kernel-side rewrites are exact."""
    w1, b1, g1, be1, w2, b2, g2, be2, res_w, wsc, bsc = params
    length = x_ncl.shape[2]

    def conv1d(x, w, b):
        k = w.shape[-1]
        p = k // 2
        xp = jnp.pad(x, ((0, 0), (0, 0), (p, p)))
        out = jnp.zeros((x.shape[0], w.shape[0], length), jnp.float32)
        for t in range(k):
            out = out + jnp.einsum('oc,ncl->nol', w[:, :, t], xp[:, :, t:t + length])
        return out + b[None, :, None]

    def bn(h, g, be):
        mean = jnp.mean(h, axis=(0, 2), keepdims=True)
        var = jnp.mean((h - mean) ** 2, axis=(0, 2), keepdims=True)
        return (h - mean) / jnp.sqrt(var + eps) * g[None, :, None] + be[None, :, None]

    ident = jnp.einsum('oc,ncl->nol', wsc[:, :, 0], x_ncl) + bsc[None, :, None]
    out = jax.nn.relu(bn(conv1d(x_ncl, w1, b1), g1, be1))
    out = bn(conv1d(out, w2, b2), g2, be2)
    return jax.nn.relu(out + res_w[0] * ident)


if __name__ == "__main__":
    N, C_IN, C_OUT, L, K = 2, 4, 8, 16, 3

    key = jax.random.PRNGKey(0)
    k_x, k_p = jax.random.split(key)
    x = jax.random.normal(k_x, (N, C_IN, L), jnp.float32)
    params = init_params(k_p, C_IN, C_OUT, K)

    # TODO(synk): BatchNorm running_mean/running_var buffer updates (training-time
    # side effect that does not affect the returned tensor) are not reproduced.
    ref = jax.block_until_ready(reference(x, params))

    # f32 matmul path: tight check; validates the exact rewrites (bias drop,
    # res_weight fold, multi-pass tiled BN stats, channel zero-padding).
    out_f32 = jax.block_until_ready(precision_block(x, params, mm_dtype=jnp.float32))
    assert out_f32.shape == (N, C_OUT, L), out_f32.shape
    np.testing.assert_allclose(np.asarray(out_f32), np.asarray(ref), atol=2e-3, rtol=2e-3)

    # bf16 matmul path (full MXU rate on v6e/v7x): looser tolerance because the
    # HBM intermediates h1/h2 are also carried in bf16 in this mode.
    out_bf16 = jax.block_until_ready(precision_block(x, params, mm_dtype=jnp.bfloat16))
    np.testing.assert_allclose(np.asarray(out_bf16), np.asarray(ref), atol=3e-2, rtol=3e-2)

    print("KERNEL_OK")
</pallas_src>

<mosaic_0001>
module attributes {stable_mosaic.version = 11 : i64} {
  func.func @_conv1_stats_kernel(%arg0: i32, %arg1: memref<1x18x128xf32, #tpu.memory_space<vmem>>, %arg2: memref<3x128x128xf32, #tpu.memory_space<vmem>>, %arg3: memref<1x16x128xf32, #tpu.memory_space<vmem>>, %arg4: memref<1x2x128xf32, #tpu.memory_space<vmem>>) attributes {dimension_semantics = [#tpu.dimension_semantics<parallel>], iteration_bounds = array<i64: 2>, scalar_prefetch = 0 : i64, scratch_operands = 0 : i64, tpu.core_type = #tpu.core_type<tc>, window_params = [{transform_indices = @transform_0, window_bounds = array<i64: 1, 18, 128>}, {pipeline_mode = #tpu.pipeline_mode<synchronous>, transform_indices = @transform_1, window_bounds = array<i64: 3, 128, 128>}, {transform_indices = @transform_2, window_bounds = array<i64: 1, 16, 128>}, {transform_indices = @transform_3, window_bounds = array<i64: 1, 2, 128>}]} {
    %cst = arith.constant 0.000000e+00 : f32
    %0 = vector.broadcast %cst : f32 to vector<16x128xf32>
    %c0 = arith.constant 0 : index
    %c0_0 = arith.constant 0 : index
    %c0_1 = arith.constant 0 : index
    %1 = vector.load %arg1[%c0, %c0_0, %c0_1] : memref<1x18x128xf32, #tpu.memory_space<vmem>>, vector<1x16x128xf32>
    %2 = vector.shape_cast %1 : vector<1x16x128xf32> to vector<16x128xf32>
    %c0_2 = arith.constant 0 : index
    %c0_3 = arith.constant 0 : index
    %c0_4 = arith.constant 0 : index
    %3 = vector.load %arg2[%c0_2, %c0_3, %c0_4] : memref<3x128x128xf32, #tpu.memory_space<vmem>>, vector<1x128x128xf32>
    %4 = vector.shape_cast %3 : vector<1x128x128xf32> to vector<128x128xf32>
    %cst_5 = arith.constant dense<0.000000e+00> : vector<16x128xf32>
    %5 = tpu.matmul %2, %4, %cst_5 {dimension_numbers = #tpu.dot_dimension_numbers<[1], [0], [0], [1], [0, 0, 1, 1], [], []>} : vector<16x128xf32>, vector<128x128xf32>, vector<16x128xf32> -> vector<16x128xf32>
    %6 = arith.addf %0, %5 : vector<16x128xf32>
    %c0_6 = arith.constant 0 : index
    %c1 = arith.constant 1 : index
    %c0_7 = arith.constant 0 : index
    %7 = vector.load %arg1[%c0_6, %c1, %c0_7] : memref<1x18x128xf32, #tpu.memory_space<vmem>>, vector<1x16x128xf32>
    %8 = vector.shape_cast %7 : vector<1x16x128xf32> to vector<16x128xf32>
    %c1_8 = arith.constant 1 : index
    %c0_9 = arith.constant 0 : index
    %c0_10 = arith.constant 0 : index
    %9 = vector.load %arg2[%c1_8, %c0_9, %c0_10] : memref<3x128x128xf32, #tpu.memory_space<vmem>>, vector<1x128x128xf32>
    %10 = vector.shape_cast %9 : vector<1x128x128xf32> to vector<128x128xf32>
    %cst_11 = arith.constant dense<0.000000e+00> : vector<16x128xf32>
    %11 = tpu.matmul %8, %10, %cst_11 {dimension_numbers = #tpu.dot_dimension_numbers<[1], [0], [0], [1], [0, 0, 1, 1], [], []>} : vector<16x128xf32>, vector<128x128xf32>, vector<16x128xf32> -> vector<16x128xf32>
    %12 = arith.addf %6, %11 : vector<16x128xf32>
    %c0_12 = arith.constant 0 : index
    %c2 = arith.constant 2 : index
    %c0_13 = arith.constant 0 : index
    %13 = vector.load %arg1[%c0_12, %c2, %c0_13] : memref<1x18x128xf32, #tpu.memory_space<vmem>>, vector<1x16x128xf32>
    %14 = vector.shape_cast %13 : vector<1x16x128xf32> to vector<16x128xf32>
    %c2_14 = arith.constant 2 : index
    %c0_15 = arith.constant 0 : index
    %c0_16 = arith.constant 0 : index
    %15 = vector.load %arg2[%c2_14, %c0_15, %c0_16] : memref<3x128x128xf32, #tpu.memory_space<vmem>>, vector<1x128x128xf32>
    %16 = vector.shape_cast %15 : vector<1x128x128xf32> to vector<128x128xf32>
    %cst_17 = arith.constant dense<0.000000e+00> : vector<16x128xf32>
    %17 = tpu.matmul %14, %16, %cst_17 {dimension_numbers = #tpu.dot_dimension_numbers<[1], [0], [0], [1], [0, 0, 1, 1], [], []>} : vector<16x128xf32>, vector<128x128xf32>, vector<16x128xf32> -> vector<16x128xf32>
    %18 = arith.addf %12, %17 : vector<16x128xf32>
    %c0_18 = arith.constant 0 : index
    %c0_19 = arith.constant 0 : index
    %c0_20 = arith.constant 0 : index
    %19 = vector.load %arg3[%c0_18, %c0_19, %c0_20] : memref<1x16x128xf32, #tpu.memory_space<vmem>>, vector<1x16x128xf32>
    %20 = vector.shape_cast %19 : vector<1x16x128xf32> to vector<16x128xf32>
    %21 = vector.shape_cast %18 : vector<16x128xf32> to vector<1x16x128xf32>
    tpu.vector_store %arg3[%c0_18, %c0_19, %c0_20], %21 {strides = array<i32>} : memref<1x16x128xf32, #tpu.memory_space<vmem>>, vector<1x16x128xf32>,
    %cst_21 = arith.constant 1.000000e+00 : f32
    %22 = vector.broadcast %cst_21 : f32 to vector<8x16xf32>
    %cst_22 = arith.constant dense<0.000000e+00> : vector<8x128xf32>
    %23 = tpu.matmul %22, %18, %cst_22 {dimension_numbers = #tpu.dot_dimension_numbers<[1], [0], [0], [1], [0, 0, 1, 1], [], []>} : vector<8x16xf32>, vector<16x128xf32>, vector<8x128xf32> -> vector<8x128xf32>
    %24 = arith.mulf %18, %18 : vector<16x128xf32>
    %cst_23 = arith.constant dense<0.000000e+00> : vector<8x128xf32>
    %25 = tpu.matmul %22, %24, %cst_23 {dimension_numbers = #tpu.dot_dimension_numbers<[1], [0], [0], [1], [0, 0, 1, 1], [], []>} : vector<8x16xf32>, vector<16x128xf32>, vector<8x128xf32> -> vector<8x128xf32>
    %26 = vector.extract_strided_slice %23 {offsets = [0, 0], sizes = [1, 128], strides = [1, 1]} : vector<8x128xf32> to vector<1x128xf32>
    %27 = vector.extract_strided_slice %25 {offsets = [0, 0], sizes = [1, 128], strides = [1, 1]} : vector<8x128xf32> to vector<1x128xf32>
    %28 = tpu.concatenate %26, %27 in 0 : vector<1x128xf32>, vector<1x128xf32> -> vector<2x128xf32>
    %c0_24 = arith.constant 0 : index
    %c0_25 = arith.constant 0 : index
    %c0_26 = arith.constant 0 : index
    %29 = vector.load %arg4[%c0_24, %c0_25, %c0_26] : memref<1x2x128xf32, #tpu.memory_space<vmem>>, vector<1x2x128xf32>
    %30 = vector.shape_cast %29 : vector<1x2x128xf32> to vector<2x128xf32>
    %31 = vector.shape_cast %28 : vector<2x128xf32> to vector<1x2x128xf32>
    tpu.vector_store %arg4[%c0_24, %c0_25, %c0_26], %31 {strides = array<i32>} : memref<1x2x128xf32, #tpu.memory_space<vmem>>, vector<1x2x128xf32>,
    return
  }
  func.func @transform_0(%arg0: i32) -> (i32, i32, i32) {
    %c0_i32 = arith.constant 0 : i32
    %c0_i32_0 = arith.constant 0 : i32
    %c0_i32_1 = arith.constant 0 : i32
    return %arg0, %c0_i32, %c0_i32_0 : i32, i32, i32
  }
  func.func @transform_1(%arg0: i32) -> (i32, i32, i32) {
    %c0_i32 = arith.constant 0 : i32
    %c0_i32_0 = arith.constant 0 : i32
    %c0_i32_1 = arith.constant 0 : i32
    %c0_i32_2 = arith.constant 0 : i32
    return %c0_i32, %c0_i32_0, %c0_i32_1 : i32, i32, i32
  }
  func.func @transform_2(%arg0: i32) -> (i32, i32, i32) {
    %c0_i32 = arith.constant 0 : i32
    %c0_i32_0 = arith.constant 0 : i32
    %c0_i32_1 = arith.constant 0 : i32
    return %arg0, %c0_i32, %c0_i32_0 : i32, i32, i32
  }
  func.func @transform_3(%arg0: i32) -> (i32, i32, i32) {
    %c0_i32 = arith.constant 0 : i32
    %c0_i32_0 = arith.constant 0 : i32
    %c0_i32_1 = arith.constant 0 : i32
    return %arg0, %c0_i32, %c0_i32_0 : i32, i32, i32
  }
}

</mosaic_0001>

<bundles_post_ra>
// kernel: tpu_custom_call.1
= control target key start
LH: loop header
LB: loop body
LE: loop exit
PB: predicated region body
PF: predicated region fallthrough
CT: control target
= control target key end

     0   :  { %9 = vsyncpa [#allocation3], 0  ;;  %s1340_s0 = inlined_call_operand.vmem [shape: f32[2,18,128], index: 0, kind: input, shape index: {}]   ;;  %s1341_s1 = inlined_call_operand.hbm [shape: f32[3,128,128], index: 1, kind: input, shape index: {}]   ;;  %s1342_s2 = inlined_call_operand.hbm [shape: f32[2,16,128], index: 2, kind: output, shape index: {0}]   ;;  %s1343_s3 = inlined_call_operand.hbm [shape: f32[2,2,128], index: 3, kind: output, shape index: {1}]  }
   0x1   :  { %10 = vsyncpa [#allocation4], 0 }
   0x2   :  { %12 = vsyncpa [#allocation4 + $0x1], 0 }
   0x3   :  { %13 = vsyncpa [#allocation7], 0 }
   0x4   :  { %15 = vsyncpa [#allocation7 + $0x1], 0  ;;  %s1183_s12 = smov 0   ;;  %s1185_s13 = smov 0  }
   0x5   :  { %s1187_s14 = smov 0   ;;  %s1189_s15 = smov 0  }
   0x6 LB: > { %s1204_s16 = sadd.s32 4294967295, %s1151_s15   ;;  %s770_s17 = sadd.s32 4294967294, %s1151_s15   ;;  %s1151_s15 = sphi %s1189_s15, %s1351_s15   ;;  %s1147_s14 = sphi %s1187_s14, %s1350_s14   ;;  %s1143_s13 = sphi %s1185_s13, %s1349_s13   ;;  %s1139_s12 = sphi %s1183_s12, %s1348_s12  }
   0x7   : > { %s1208_s18 = sadd.s32 1, %s1151_s15   ;;  %s75_s19 = sadd.s32 1, %s1147_s14 }
   0x8   : > { %s72_s20 = ssub.s32 %s1151_s15, %s1208_s18  ;;  %p85_p0 = scmp.ne.s32.totalorder %s1147_s14, %s1143_s13 }
   0x9   : > { %p73_p1 = scmp.eq.s32.totalorder %s72_s20, 0  ;;  %p86_p2 = scmp.eq.s32.totalorder %s1204_s16, 1 }
   0xa   : > { %p91_p3 = scmp.ne.s32.totalorder %s1143_s13, %s1139_s12  ;;  %p92_p4 = scmp.eq.s32.totalorder %s770_s17, 1 }
   0xb   : > { %s1219_s21 = scalar_select %p73_p1, %s1147_s14, %s75_s19  }
   0xc   : > { %p1221_p5 = por %p86_p2, %p85_p0  ;;  %p1225_p6 = por %p92_p4, %p91_p3 }
   0xd   : > { %p771_p7 = scmp.ge.s32.totalorder %s1151_s15, 1  ;;  %p125_p8 = scmp.lt.s32.totalorder %s1151_s15, 3 }
   0xe   : > { %s1345_s23 = scalar_select %p1225_p6, 1, 0 }
   0xf   : > { %p988_p9 = scmp.eq.s32.totalorder %s1204_s16, 0  ;;  %p1232_p10 = pnand %p771_p7, %p125_p8 }
  0x10   : > { %s1153_s25 = smov [#allocation2]  }
  0x11   : > { %s137_s26 = sshll.u32 %s1153_s25, 4  ;;  %p977_p11 = pneg %p1232_p10  ;;  %s138_s26 = int_to_ptr.vmem [resolvable:$true] %s137_s26 }
  0x12   : > { %s1042_s27 = scalar_lea.vmem %s138_s26, 6144  ;;  %p1050_p3 = scmp.lt.s32.totalorder %s138_s26, %s138_s26 }
  0x13   : > { %p978_p12 = pnand %p988_p9, %p977_p11  ;;  %p1043_p0 = scmp.ne.s32.totalorder %s138_s26, %s1042_s27 }
  0x14   : > { %p1051_p4 = scmp.lt.s32.totalorder %s1042_s27, %s1042_s27 }
  0x15   : > { %p1033_p13 = pneg %p978_p12 }
  0x16   : > { %p1052_p6 = por %p1051_p4, %p1050_p3 }
  0x17   : > { %p1045_p1 = pnand %p1043_p0, %p1033_p13 }
  0x19   : > { %p1046_p2 = pneg %p1045_p1 }
  0x1b   : > { %p1053_p7 = pnand %p1052_p6, %p1046_p2 }
  0x1d   : > { %1056 = shalt.err (!%p1053_p7)
}
  0x1e   : > { %s1154_s28 = smov 128   ;;  %s1155_s29 = smov 8  }
  0x1f   : > { %980 = dma.hbm_to_vmem [thread:$0]  (!%p978_p12), %s1341_s1, 6144, %s138_s26, [#allocation3], %s1154_s28, %s1154_s28, %s1155_s29  }
  0x20   : > { %161 = sbr.rel (%p1232_p10) target bundleno = 516 (0x204), region = 28 }
  0x25   : > { %1126 = dma.done.wait (%p988_p9), [#allocation3], 6144  }
  0x26   : > { %1128 = vsyncadd (%p988_p9), [#allocation3], 4294961152  ;;  %v231_v0 = vld [vmem:[#allocation2 + $0xf8] sm:$0xff]  ;;  %v230_v2 = vld [vmem:[#allocation2 + $0xf0] sm:$0xff]  ;;  %p190_p6 = scmp.lt.s32.totalorder %s1204_s16, 1  ;;  %v1156_v54 = vmov 0.0  }
  0x27   : > { %v212_v1 = vld [vmem:[#allocation2 + $0x78] sm:$0xff]  ;;  %849 = vmatprep.subr.mxu0 %v231_v0  ;;  %v211_v3 = vld [vmem:[#allocation2 + $0x70] sm:$0xff]  ;;  %v229_v4 = vld [vmem:[#allocation2 + $0xe8] sm:$0xff]  ;;  %vm1157_vm0 = vmmov 0   ;;  %s1264_s10 = sand.u32 1, %s1143_s13   ;;  %vm480_vm1 = vcmask 130048  }
  0x28   : > { %884 = vmatprep.subr.mxu1 %v212_v1  ;;  %850 = vmatpush3.msra.mxu0 %v231_v0  ;;  %v210_v5 = vld [vmem:[#allocation2 + $0x68] sm:$0xff]  ;;  %v228_v6 = vld [vmem:[#allocation2 + $0xe0] sm:$0xff]  ;;  %v227_v8 = vld [vmem:[#allocation2 + $0xd8] sm:$0xff]  ;;  %s191_s5 = scalar_select %p190_p6, %s1204_s16, 1 }
  0x29   : > { %885 = vmatpush3.msra.mxu1 %v212_v1  ;;  %851 = vmatprep.subr.mxu0 %v230_v2  ;;  %v209_v7 = vld [vmem:[#allocation2 + $0x60] sm:$0xff]  ;;  %v208_v9 = vld [vmem:[#allocation2 + $0x58] sm:$0xff]  ;;  %v226_v10 = vld [vmem:[#allocation2 + $0xd0] sm:$0xff]  ;;  %s776_s11 = sshll.u32 %s1264_s10, 4  ;;  %s788_s20 = sshll.u32 %s1204_s16, 8 }
  0x2a   : > { %886 = vmatprep.subr.mxu1 %v211_v3  ;;  %852 = vmatpush3.msra.mxu0 %v230_v2  ;;  %v207_v11 = vld [vmem:[#allocation2 + $0x50] sm:$0xff]  ;;  %v225_v12 = vld [vmem:[#allocation2 + $0xc8] sm:$0xff]  ;;  %v224_v14 = vld [vmem:[#allocation2 + $0xc0] sm:$0xff]  ;;  %s968_s6 = smul.u32 24, %s191_s5  ;;  %s182_s17 = scalar_lea.vmem [#allocation5], %s776_s11  ;;  %v1158_v2 = vmov 1.0  }
  0x2b   : > { %887 = vmatpush3.msra.mxu1 %v211_v3  ;;  %853 = vmatprep.subr.mxu0 %v229_v4  ;;  %v206_v13 = vld [vmem:[#allocation2 + $0x48] sm:$0xff]  ;;  %v205_v15 = vld [vmem:[#allocation2 + $0x40] sm:$0xff]  ;;  %v223_v16 = vld [vmem:[#allocation2 + $0xb8] sm:$0xff]  ;;  %s651_s19 = sshll.u32 %s182_s17, 4  ;;  %s1274_s26 = scalar_lea.hbm %s1342_s2, %s788_s20  ;;  %s1268_s19 = int_to_ptr.vmem [resolvable:$true] %s651_s19 }
  0x2c   : > { %888 = vmatprep.subr.mxu1 %v210_v5  ;;  %854 = vmatpush3.msra.mxu0 %v229_v4  ;;  %v204_v17 = vld [vmem:[#allocation2 + $0x38] sm:$0xff]  ;;  %v222_v18 = vld [vmem:[#allocation2 + $0xb0] sm:$0xff]  ;;  %v221_v20 = vld [vmem:[#allocation2 + $0xa8] sm:$0xff]  ;;  %s1254_s9 = scalar_lea.vmem %s1340_s0, %s968_s6  ;;  %s633_s27 = scalar_lea.sflag [#allocation4], %s1264_s10 }
  0x2d   : > { %889 = vmatpush3.msra.mxu1 %v210_v5  ;;  %855 = vmatprep.subr.mxu0 %v228_v6  ;;  %v203_v19 = vld [vmem:[#allocation2 + $0x30] sm:$0xff]  ;;  %v202_v21 = vld [vmem:[#allocation2 + $0x28] sm:$0xff]  ;;  %v220_v22 = vld [vmem:[#allocation2 + $0xa0] sm:$0xff]  ;;  %s1057_s28 = scalar_lea.vmem %s1268_s19, 256  ;;  %s1159_s29 = smov [#allocation5]  }
  0x2e   : > { %890 = vmatprep.subr.mxu1 %v209_v7  ;;  %856 = vmatpush3.msra.mxu0 %v228_v6  ;;  %v201_v23 = vld [vmem:[#allocation2 + $0x20] sm:$0xff]  ;;  %v219_v24 = vld [vmem:[#allocation2 + $0x98] sm:$0xff]  ;;  %v218_v26 = vld [vmem:[#allocation2 + $0x90] sm:$0xff]  ;;  %p1058_p8 = scmp.ne.s32.totalorder %s1268_s19, %s1057_s28  ;;  %s1061_s30 = sshll.u32 %s1159_s29, 4  ;;  %s1062_s30 = int_to_ptr.vmem [resolvable:$false] %s1061_s30 }
  0x2f   : > { %891 = vmatpush3.msra.mxu1 %v209_v7  ;;  %857 = vmatprep.subr.mxu0 %v227_v8  ;;  %v200_v25 = vld [vmem:[#allocation2 + $0x18] sm:$0xff]  ;;  %v199_v27 = vld [vmem:[#allocation2 + $0x10] sm:$0xff]  ;;  %v217_v28 = vld [vmem:[#allocation2 + $0x88] sm:$0xff]  ;;  %s1063_s4 = scalar_lea.vmem %s1062_s30, 512  ;;  %p1064_p11 = scmp.lt.s32.totalorder %s1268_s19, %s1062_s30 }
  0x30   : > { %892 = vmatprep.subr.mxu1 %v208_v9  ;;  %858 = vmatpush3.msra.mxu0 %v227_v8  ;;  %v198_v29 = vld [vmem:[#allocation2 + $0x8] sm:$0xff]  ;;  %v216_v30 = vld [vmem:[#allocation2 + $0x80] sm:$0xff]  ;;  %v400_v36 = vld [vmem:[#allocation2 + $0x178] sm:$0xff]  ;;  %p1059_p9 = pnand %p1058_p8, %p1221_p5  ;;  %p1065_p12 = scmp.lt.s32.totalorder %s1063_s4, %s1057_s28 }
  0x31   : > { %893 = vmatpush3.msra.mxu1 %v208_v9  ;;  %859 = vmatprep.subr.mxu0 %v226_v10  ;;  %v197_v31 = vld [vmem:[#allocation2] sm:$0xff]  ;;  %v214_v34 = vld [vmem:[%s1254_s9 + $0x9] sm:$0xff]  ;;  %v396_v41 = vld [vmem:[#allocation2 + $0x158] sm:$0xff] }
  0x32   : > { %894 = vmatprep.subr.mxu1 %v207_v11  ;;  %860 = vmatpush3.msra.mxu0 %v226_v10  ;;  %v213_v32 = vld [vmem:[%s1254_s9 + $0x1] sm:$0xff]  ;;  %v399_v38 = vld [vmem:[#allocation2 + $0x170] sm:$0xff]  ;;  %v392_v45 = vld [vmem:[#allocation2 + $0x138] sm:$0xff]  ;;  %p1060_p10 = pneg %p1059_p9  ;;  %p1066_p13 = por %p1065_p12, %p1064_p11 }
  0x33   : > { %895 = vmatpush3.msra.mxu1 %v207_v11  ;;  %861 = vmatprep.subr.mxu0 %v225_v12  ;;  %v195_v33 = vld [vmem:[%s1254_s9] sm:$0xff]  ;;  %v196_v35 = vld [vmem:[%s1254_s9 + $0x8] sm:$0xff]  ;;  %v395_v42 = vld [vmem:[#allocation2 + $0x150] sm:$0xff] }
  0x34   : > { %896 = vmatprep.subr.mxu1 %v206_v13  ;;  %862 = vmatpush3.msra.mxu0 %v225_v12  ;;  %v382_v37 = vld [vmem:[%s1254_s9 + $0x2] sm:$0xff]  ;;  %v391_v46 = vld [vmem:[#allocation2 + $0x130] sm:$0xff]  ;;  %v388_v49 = vld [vmem:[#allocation2 + $0x118] sm:$0xff]  ;;  %p1067_p0 = pnand %p1066_p13, %p1060_p10 }
  0x35   : > { %897 = vmatpush3.msra.mxu1 %v206_v13  ;;  %863 = vmatprep.subr.mxu0 %v224_v14  ;;  %v398_v39 = vld [vmem:[#allocation2 + $0x168] sm:$0xff]  ;;  %v397_v40 = vld [vmem:[#allocation2 + $0x160] sm:$0xff]  ;;  %v387_v50 = vld [vmem:[#allocation2 + $0x110] sm:$0xff] }
  0x36   : > { %898 = vmatprep.subr.mxu1 %v205_v15  ;;  %864 = vmatpush3.msra.mxu0 %v224_v14  ;;  %v394_v43 = vld [vmem:[#allocation2 + $0x148] sm:$0xff]  ;;  %v393_v44 = vld [vmem:[#allocation2 + $0x140] sm:$0xff] }
  0x37   : > { %899 = vmatpush3.msra.mxu1 %v205_v15  ;;  %865 = vmatprep.subr.mxu0 %v223_v16  ;;  %v390_v47 = vld [vmem:[#allocation2 + $0x128] sm:$0xff]  ;;  %v389_v48 = vld [vmem:[#allocation2 + $0x120] sm:$0xff] }
  0x38   : > { %900 = vmatprep.subr.mxu1 %v204_v17  ;;  %866 = vmatpush3.msra.mxu0 %v223_v16  ;;  %v386_v51 = vld [vmem:[#allocation2 + $0x108] sm:$0xff]  ;;  %v385_v52 = vld [vmem:[#allocation2 + $0x100] sm:$0xff] }
  0x39   : > { %901 = vmatpush3.msra.mxu1 %v204_v17  ;;  %867 = vmatprep.subr.mxu0 %v222_v18  ;;  %v383_v53 = vld [vmem:[%s1254_s9 + $0xa] sm:$0xff] }
  0x3a   : > { %902 = vmatprep.subr.mxu1 %v203_v19  ;;  %868 = vmatpush3.msra.mxu0 %v222_v18 }
  0x3b   : > { %903 = vmatpush3.msra.mxu1 %v203_v19  ;;  %869 = vmatprep.subr.mxu0 %v221_v20 }
  0x3c   : > { %904 = vmatprep.subr.mxu1 %v202_v21  ;;  %870 = vmatpush3.msra.mxu0 %v221_v20 }
  0x3d   : > { %905 = vmatpush3.msra.mxu1 %v202_v21  ;;  %871 = vmatprep.subr.mxu0 %v220_v22 }
  0x3e   : > { %906 = vmatprep.subr.mxu1 %v201_v23  ;;  %872 = vmatpush3.msra.mxu0 %v220_v22 }
  0x3f   : > { %907 = vmatpush3.msra.mxu1 %v201_v23  ;;  %873 = vmatprep.subr.mxu0 %v219_v24 }
  0x40   : > { %908 = vmatprep.subr.mxu1 %v200_v25  ;;  %874 = vmatpush3.msra.mxu0 %v219_v24 }
  0x41   : > { %909 = vmatpush3.msra.mxu1 %v200_v25  ;;  %875 = vmatprep.subr.mxu0 %v218_v26 }
  0x42   : > { %910 = vmatprep.subr.mxu1 %v199_v27  ;;  %876 = vmatpush3.msra.mxu0 %v218_v26 }
  0x43   : > { %911 = vmatpush3.msra.mxu1 %v199_v27  ;;  %877 = vmatprep.subr.mxu0 %v217_v28 }
  0x44   : > { %912 = vmatprep.subr.mxu1 %v198_v29  ;;  %878 = vmatpush3.msra.mxu0 %v217_v28 }
  0x45   : > { %913 = vmatpush3.msra.mxu1 %v198_v29  ;;  %879 = vmatprep.subr.mxu0 %v216_v30 }
  0x46   : > { %914 = vmatprep.subr.mxu1 %v197_v31  ;;  %880 = vmatpush3.msra.mxu0 %v216_v30 }
  0x47   : > { %881 = vmatprep.mubr.f32.mxu0 %v213_v32  ;;  %915 = vmatpush3.msra.mxu1 %v197_v31 }
  0x48   : > { %916 = vmatprep.mubr.f32.mxu1 %v195_v33  ;;  %882 = vmatmul.mubr.f32.vlgmr.msra.gmra.mxu0 %v214_v34 }
  0x49   : > { %917 = vmatmul.mubr.f32.vlgmr.msra.gmra.mxu1 %v196_v35  ;;  %919 = vmatprep.subr.mxu0 %v400_v36 }
  0x4a   : > { %951 = vmatprep.mubr.f32.mxu0 %v382_v37  ;;  %920 = vmatpush3.msra.mxu0 %v400_v36 }
  0x4b   : > { %921 = vmatprep.subr.mxu0 %v399_v38  ;;  %954 = vmatprep.subr.mxu1 %v1156_v54 }
  0x4c   : > { %922 = vmatpush3.msra.mxu0 %v399_v38  ;;  %958 = vmatprep.mubr.msk.f32.mxu1 %vm1157_vm0, %v1156_v54 }
  0x4d   : > { %923 = vmatprep.subr.mxu0 %v398_v39 }
  0x4e   : > { %924 = vmatpush3.msra.mxu0 %v398_v39 }
  0x4f   : > { %925 = vmatprep.subr.mxu0 %v397_v40 }
  0x50   : > { %926 = vmatpush3.msra.mxu0 %v397_v40 }
  0x51   : > { %927 = vmatprep.subr.mxu0 %v396_v41 }
  0x52   : > { %928 = vmatpush3.msra.mxu0 %v396_v41 }
  0x53   : > { %929 = vmatprep.subr.mxu0 %v395_v42 }
  0x54   : > { %930 = vmatpush3.msra.mxu0 %v395_v42 }
  0x55   : > { %931 = vmatprep.subr.mxu0 %v394_v43 }
  0x56   : > { %932 = vmatpush3.msra.mxu0 %v394_v43 }
  0x57   : > { %933 = vmatprep.subr.mxu0 %v393_v44 }
  0x58   : > { %934 = vmatpush3.msra.mxu0 %v393_v44 }
  0x59   : > { %935 = vmatprep.subr.mxu0 %v392_v45 }
  0x5a   : > { %936 = vmatpush3.msra.mxu0 %v392_v45 }
  0x5b   : > { %937 = vmatprep.subr.mxu0 %v391_v46 }
  0x5c   : > { %938 = vmatpush3.msra.mxu0 %v391_v46 }
  0x5d   : > { %939 = vmatprep.subr.mxu0 %v390_v47 }
  0x5e   : > { %940 = vmatpush3.msra.mxu0 %v390_v47 }
  0x5f   : > { %941 = vmatprep.subr.mxu0 %v389_v48 }
  0x60   : > { %942 = vmatpush3.msra.mxu0 %v389_v48 }
  0x61   : > { %943 = vmatprep.subr.mxu0 %v388_v49 }
  0x62   : > { %944 = vmatpush3.msra.mxu0 %v388_v49 }
  0x63   : > { %945 = vmatprep.subr.mxu0 %v387_v50 }
  0x64   : > { %946 = vmatpush3.msra.mxu0 %v387_v50 }
  0x65   : > { %947 = vmatprep.subr.mxu0 %v386_v51 }
  0x66   : > { %948 = vmatpush3.msra.mxu0 %v386_v51 }
  0x67   : > { %949 = vmatprep.subr.mxu0 %v385_v52 }
  0x68   : > { %950 = vmatpush3.msra.mxu0 %v385_v52 }
  0x69   : > { %952 = vmatmul.mubr.f32.vlgmr.msra.gmra.mxu0 %v383_v53 }
 0x108   : > { %v883_v55 = vpop.f32.mrf.mxu0 }
 0x109   : > { %v918_v56 = vpop.f32.mrf.mxu1 }
 0x10a   : > { %v298_v57 = vpop.f32.mrf.mxu0  ;;  %v379_v59 = vadd.f32 %v918_v56, %v883_v55 }
 0x10b   : > { %v373_v58 = vpop.f32.mrf.mxu1 }
 0x10c   : > { %v374_v61 = vadd.f32 %v373_v58, %v298_v57 }
 0x129   : > { %v953_v60 = vpop.f32.mrf.mxu0 }
 0x12a   : > { %v477_v62 = vadd.f32 %v953_v60, %v379_v59 }
 0x12b   : > { %v467_v63 = vpop.f32.mrf.mxu0 }
 0x12c   : > { %479 = vst [vmem:[%s182_s17 + $0x8] sm:$0xff] %v477_v62  ;;  %v476_v0 = vadd.f32 %v467_v63, %v374_v61  ;;  %955 = vmatpush3.msra.mxu1 %v477_v62  ;;  %v555_v1 = vmul.f32 %v477_v62, %v477_v62 }
 0x12d   : > { %956 = vmatprep.subr.mxu1 %v1156_v54 }
 0x12e   : > { %478 = vst [vmem:[%s182_s17] sm:$0xff] %v476_v0  ;;  %957 = vmatpush3.msra.mxu1 %v476_v0  ;;  %v554_v3 = vmul.f32 %v476_v0, %v476_v0 }
 0x12f   : > { %959 = vmatmul.mubr.msk.f32.vlgmr.msra.gmra.mxu1 %vm480_vm1, %v1158_v2  ;;  %961 = vmatprep.subr.mxu1 %v1156_v54 }
 0x130   : > { %962 = vmatpush3.msra.mxu1 %v555_v1  ;;  %965 = vmatprep.mubr.msk.f32.mxu1 %vm1157_vm0, %v1156_v54 }
 0x131   : > { %963 = vmatprep.subr.mxu1 %v1156_v54 }
 0x132   : > { %964 = vmatpush3.msra.mxu1 %v554_v3 }
 0x133   : > { %966 = vmatmul.mubr.msk.f32.vlgmr.msra.gmra.mxu1 %vm480_vm1, %v1158_v2 }
 0x134   : > { %1070 = shalt.err (!%p1067_p0)
}
 0x135   : > { %s1071_s5 = scalar_lea.hbm %s1274_s26, 256  ;;  %s1075_s8 = scalar_lea.hbm %s1342_s2, 512 }
 0x136   : > { %p1072_p1 = scmp.ne.s32.totalorder %s1274_s26, %s1071_s5  ;;  %p1076_p4 = scmp.lt.s32.totalorder %s1274_s26, %s1342_s2 }
 0x137   : > { %p1077_p7 = scmp.lt.s32.totalorder %s1075_s8, %s1071_s5 }
 0x138   : > { %p1073_p2 = pnand %p1072_p1, %p1221_p5 }
 0x139   : > { %p1078_p6 = por %p1077_p7, %p1076_p4 }
 0x13a   : > { %p1074_p3 = pneg %p1073_p2 }
 0x13c   : > { %p1079_p8 = pnand %p1078_p6, %p1074_p3 }
 0x13e   : > { %1082 = shalt.err (!%p1079_p8)
}
 0x13f   : > { %s1160_s17 = smov 128   ;;  %s1161_s20 = smov 8   ;;  %vm629_vm2 = vcmask 1040384  }
 0x140   : > { %973 = dma.vmem_to_hbm [thread:$0]  (%p1221_p5), %s1268_s19, 256, %s1274_s26, %s633_s27, %s1160_s17, %s1160_s17, %s1161_s20  }
 0x141   : > { %s777_s24 = sshll.u32 %s1264_s10, 1  ;;  %s785_s25 = sshll.u32 %s1204_s16, 5 }
 0x142   : > { %s189_s28 = scalar_lea.vmem [#allocation6], %s777_s24  ;;  %s1304_s5 = scalar_lea.hbm %s1343_s3, %s785_s25 }
 0x143   : > { %s667_s29 = sshll.u32 %s189_s28, 4  ;;  %s638_s19 = scalar_lea.sflag [#allocation7], %s1264_s10  ;;  %s668_s29 = int_to_ptr.vmem [resolvable:$true] %s667_s29 }
 0x144   : > { %s1083_s26 = scalar_lea.vmem %s668_s29, 32  ;;  %s1162_s16 = smov [#allocation6]  }
 0x145   : > { %p1084_p9 = scmp.ne.s32.totalorder %s668_s29, %s1083_s26  ;;  %s1087_s27 = sshll.u32 %s1162_s16, 4  ;;  %s1088_s27 = int_to_ptr.vmem [resolvable:$false] %s1087_s27 }
 0x146   : > { %s1089_s6 = scalar_lea.vmem %s1088_s27, 64  ;;  %p1090_p12 = scmp.lt.s32.totalorder %s668_s29, %s1088_s27 }
 0x147   : > { %p1085_p10 = pnand %p1084_p9, %p1221_p5  ;;  %p1091_p13 = scmp.lt.s32.totalorder %s1089_s6, %s1083_s26 }
 0x149   : > { %p1086_p11 = pneg %p1085_p10  ;;  %p1092_p0 = por %p1091_p13, %p1090_p12 }
 0x14b   : > { %p1093_p1 = pnand %p1092_p0, %p1086_p11 }
 0x1ef   : > { %v550_v4 = vpop.f32.mrf.mxu1 }
 0x1f1   : > { %v960_v5 = vpop.f32.mrf.mxu1 }
 0x1f3   : > { %v622_v6 = vpop.f32.mrf.mxu1 }
 0x1f4   : > { %v627_v7 = vrot.slane %v622_v6, 7 }
 0x1f5   : > { %v967_v8 = vpop.f32.mrf.mxu1 }
 0x1f6   : > { %v630_v9 = vsel %vm629_vm2, %v550_v4, %v627_v7 }
 0x1f7   : > { %631 = vst [vmem:[%s189_s28] sm:$0x3] %v630_v9 }
 0x1f8   : > { %1096 = shalt.err (!%p1093_p1)
}
 0x1f9   : > { %s1097_s7 = scalar_lea.hbm %s1304_s5, 32  ;;  %s1101_s9 = scalar_lea.hbm %s1343_s3, 64 }
 0x1fa   : > { %p1098_p2 = scmp.ne.s32.totalorder %s1304_s5, %s1097_s7  ;;  %p1102_p7 = scmp.lt.s32.totalorder %s1304_s5, %s1343_s3 }
 0x1fb   : > { %p1103_p6 = scmp.lt.s32.totalorder %s1101_s9, %s1097_s7 }
 0x1fc   : > { %p1099_p3 = pnand %p1098_p2, %p1221_p5 }
 0x1fd   : > { %p1104_p8 = por %p1103_p6, %p1102_p7 }
 0x1fe   : > { %p1100_p4 = pneg %p1099_p3 }
 0x200   : > { %p1105_p9 = pnand %p1104_p8, %p1100_p4 }
 0x202   : > { %1108 = shalt.err (!%p1105_p9)
}
 0x203   : > { %974 = dma.vmem_to_hbm [thread:$0]  (%p1221_p5), %s668_s29, 32, %s1304_s5, %s638_s19  }
 0x204 PF: > { %p990_p10 = scmp.ge.s32.totalorder %s1151_s15, 2  ;;  %s679_s20 = sand.u32 1, %s1139_s12  }
 0x205   : > { %p1347_p11 = scmp.ne.s32.totalorder %s1345_s23, 0  ;;  %s680_s24 = scalar_lea.sflag [#allocation4], %s679_s20 }
 0x207   : > { %p982_p12 = pnand %p990_p10, %p1347_p11 }
 0x209   : > { %p983_p13 = pneg %p982_p12 }
 0x20b   : > { %1130 = dma.done.wait (%p983_p13), %s680_s24, 256  }
 0x20c   : > { %1132 = vsyncadd (%p983_p13), %s680_s24, 4294967040  ;;  %s689_s25 = scalar_lea.sflag [#allocation7], %s679_s20 }
 0x20d   : > { %1134 = dma.done.wait (%p983_p13), %s689_s25, 32  }
 0x20e   : > { %1136 = vsyncadd (%p983_p13), %s689_s25, 4294967264  ;;  %p18_p5 = scmp.ge.s32.totalorder %s1208_s18, 4   ;;  %s1348_s12 = smov %s1143_s13 }
 0x20f   : > { %s1349_s13 = smov %s1147_s14  ;;  %s1350_s14 = smov %s1219_s21 }
 0x210   : > { %s1351_s15 = smov %s1208_s18  ;;  %20 = sbr.rel (!%p18_p5) target bundleno = 6 (0x6), region = 87 }
 0x215   :  { %694 = vsyncpa [#allocation3], 1 }
 0x216   :  { %696 = vsyncpa [#allocation3 + $0x1], 1 }
 0x217   :  { %697 = vsyncpa [#allocation4], 1 }
 0x218   :  { %699 = vsyncpa [#allocation4 + $0x1], 1 }
 0x219   :  { %700 = vsyncpa [#allocation7], 1 }
 0x21a   :  { %702 = vsyncpa [#allocation7 + $0x1], 1 }

</bundles_post_ra>
